<compile_context>
chip_gen: v7x
topology: tpu7x:2x2x1
jax: 0.10.0
libtpu: 0.0.40
codegen_flags: <defaults>
</compile_context>

<pallas_src>
from typing import NamedTuple

import numpy as np
import jax
import jax.numpy as jnp
from jax.experimental import pallas as pl
from jax.experimental.pallas import tpu as pltpu

# First 36 elements of the periodic table (enough for typical ANI species sets).
PERIODIC_TABLE = (
    "H He Li Be B C N O F Ne Na Mg Al Si P S Cl Ar K Ca "
    "Sc Ti V Cr Mn Fe Co Ni Cu Zn Ga Ge As Se Br Kr"
).split()

_LANES = 128
# ~2 MiB per block: double-buffered in+out => 8 MiB pipelined footprint,
# safe on v5e (16 MiB scoped default), v6e (32 MiB) and v7x (64 MiB physical).
_TARGET_BLOCK_BYTES = 2 * 1024 * 1024


class SpeciesCoordinates(NamedTuple):
    species: jax.Array
    coordinates: jax.Array


def _round_up(x, m):
    return -(-x // m) * m


def _pick_row_tile(rows, row_bytes):
    """Row-tile size: ~2 MiB blocks; >=2 blocks when there's enough work."""
    target = max(8, _TARGET_BLOCK_BYTES // max(row_bytes, 1))
    target -= target % 8
    target = max(target, 8)
    if rows > target:
        return target
    # Modest input that still carries >=1 MiB: emit two blocks so v7x's two
    # TensorCores split the rows (dimension_semantics=("parallel",)).
    if rows >= 16 and rows * row_bytes >= (1 << 20):
        half = _round_up(-(-rows // 2), 8)
        if half < rows:
            return half
    return rows  # single block covering the full array (== full dims: always legal)


def _make_lookup_kernel(pairs):
    """Unrolled cmp+select chain with the LUT baked in as immediates."""

    def kernel(sp_ref, out_ref):
        sp = sp_ref[...]
        out = jnp.full(sp.shape, -1, dtype=jnp.int32)  # unsupported -> -1
        for z, idx in pairs:  # tiny static set: a few VPU cmp+select per vreg
            out = jnp.where(sp == z, jnp.int32(idx), out)
        out_ref[...] = out

    return kernel


class SpeciesConverter:
    """JAX/Pallas port of torchani.nn.SpeciesConverter."""

    def __init__(self, species, *, min_pallas_elements=0):
        rev_idx = {s: k for k, s in enumerate(PERIODIC_TABLE, 1)}
        maxidx = max(rev_idx.values())
        conv = np.full((maxidx + 2,), -1, dtype=np.int32)
        for i, s in enumerate(species):
            conv[rev_idx[s]] = i
        # Buffer kept for parity / reference checks (PyTorch registers it).
        self.conv_tensor = jnp.asarray(conv)
        # Host-side extraction done ONCE here (never in the forward path).
        valid_z = np.nonzero(conv >= 0)[0]
        self._pairs = tuple((int(z), int(conv[z])) for z in valid_z)
        self._kernel = _make_lookup_kernel(self._pairs)
        # For tiny inputs kernel-launch overhead dominates; set e.g. 1 << 17
        # to fall back to a plain XLA gather below that size.  Default 0 so
        # the Pallas kernel always runs in this demo.
        self._min_pallas_elements = min_pallas_elements

    def _lookup_2d(self, sp_2d):
        rows, cols = sp_2d.shape
        tr = _pick_row_tile(rows, cols * 4)
        return pl.pallas_call(
            self._kernel,
            out_shape=jax.ShapeDtypeStruct((rows, cols), jnp.int32),
            grid=(pl.cdiv(rows, tr),),
            in_specs=[pl.BlockSpec((tr, cols), lambda i: (i, 0))],
            out_specs=pl.BlockSpec((tr, cols), lambda i: (i, 0)),
            compiler_params=pltpu.CompilerParams(
                dimension_semantics=("parallel",),  # shard row tiles across TCs
            ),
        )(sp_2d)

    def __call__(self, input_, cell=None, pbc=None):
        """Convert species from atomic numbers to 0, 1, 2, ... indexing."""
        species, coordinates = input_
        if species.ndim != 2:
            raise ValueError("species must have shape (batch, atoms)")
        sp = species.astype(jnp.int32)
        B, A = sp.shape
        M = B * A

        if M < self._min_pallas_elements:
            # Tiny problem: plain XLA gather beats any kernel launch.
            out = jnp.take(self.conv_tensor, sp, axis=0)
        elif M % _LANES == 0:
            # Lane-dense view: free reshape, full-width 128-lane loads/stores.
            rows = M // _LANES
            out = self._lookup_2d(sp.reshape(rows, _LANES)).reshape(B, A)
        else:
            # Grid directly over (B, A) with full-A blocks: no pad / slice
            # round trips (each would be an extra HBM pass).
            out = self._lookup_2d(sp)

        # Coordinates are returned unchanged, exactly as in the PyTorch forward.
        # TODO(synk): PyTorch raises on out-of-range atomic numbers; here they map to -1.
        return SpeciesCoordinates(out, coordinates)


if __name__ == "__main__":
    key = jax.random.PRNGKey(0)
    k1, k2, k3, k4 = jax.random.split(key, 4)

    # ANI-style converter: H, C, N, O -> 0, 1, 2, 3
    converter = SpeciesConverter(["H", "C", "N", "O"])
    atomic_numbers = jnp.array([1, 6, 7, 8], dtype=jnp.int32)

    # Case 1: B*A not a multiple of 128 -> direct (B, A) grid path.
    B1, A1 = 2, 8
    sp1 = atomic_numbers[jax.random.randint(k1, (B1, A1), 0, 4)]
    xyz1 = jax.random.normal(k2, (B1, A1, 3), dtype=jnp.float32)
    out1 = converter((sp1, xyz1))
    jax.block_until_ready(out1)
    assert jnp.array_equal(out1.species, converter.conv_tensor[sp1])
    assert jnp.array_equal(out1.coordinates, xyz1)
    assert out1.species.dtype == jnp.int32

    # Case 2: B*A multiple of 128 -> lane-dense path; also check jittability.
    B2, A2 = 8, 32  # M = 256 -> (2, 128) lane-dense slab
    sp2 = atomic_numbers[jax.random.randint(k3, (B2, A2), 0, 4)]
    xyz2 = jax.random.normal(k4, (B2, A2, 3), dtype=jnp.float32)
    fwd = jax.jit(lambda s, c: converter((s, c)))
    out2 = fwd(sp2, xyz2)
    jax.block_until_ready(out2)
    assert jnp.array_equal(out2.species, converter.conv_tensor[sp2])
    assert jnp.array_equal(out2.coordinates, xyz2)

    # Case 3: unsupported element (He, Z=2) must map to -1.
    sp3 = jnp.full((1, 8), 2, dtype=jnp.int32)
    out3 = converter((sp3, xyz1[:1]))
    jax.block_until_ready(out3)
    assert jnp.all(out3.species == -1)

    print("KERNEL_OK")
</pallas_src>

<mosaic_0001>
module attributes {stable_mosaic.version = 11 : i64} {
  func.func @kernel(%arg0: i32, %arg1: memref<2x8xi32, #tpu.memory_space<vmem>>, %arg2: memref<2x8xi32, #tpu.memory_space<vmem>>) attributes {dimension_semantics = [#tpu.dimension_semantics<parallel>], iteration_bounds = array<i64: 1>, scalar_prefetch = 0 : i64, scratch_operands = 0 : i64, tpu.core_type = #tpu.core_type<tc>, window_params = [{transform_indices = @transform_0, window_bounds = array<i64: 2, 8>}, {transform_indices = @transform_1, window_bounds = array<i64: 2, 8>}]} {
    %c0 = arith.constant 0 : index
    %c0_0 = arith.constant 0 : index
    %0 = vector.load %arg1[%c0, %c0_0] : memref<2x8xi32, #tpu.memory_space<vmem>>, vector<2x8xi32>
    %c-1_i32 = arith.constant -1 : i32
    %1 = vector.broadcast %c-1_i32 : i32 to vector<2x8xi32>
    %c1_i32 = arith.constant 1 : i32
    %2 = vector.broadcast %c1_i32 : i32 to vector<2x8xi32>
    %3 = arith.cmpi eq, %0, %2 : vector<2x8xi32>
    %c0_i32 = arith.constant 0 : i32
    %4 = vector.broadcast %c0_i32 : i32 to vector<2x8xi32>
    %5 = arith.select %3, %4, %1 : vector<2x8xi1>, vector<2x8xi32>
    %c6_i32 = arith.constant 6 : i32
    %6 = vector.broadcast %c6_i32 : i32 to vector<2x8xi32>
    %7 = arith.cmpi eq, %0, %6 : vector<2x8xi32>
    %c1_i32_1 = arith.constant 1 : i32
    %8 = vector.broadcast %c1_i32_1 : i32 to vector<2x8xi32>
    %9 = arith.select %7, %8, %5 : vector<2x8xi1>, vector<2x8xi32>
    %c7_i32 = arith.constant 7 : i32
    %10 = vector.broadcast %c7_i32 : i32 to vector<2x8xi32>
    %11 = arith.cmpi eq, %0, %10 : vector<2x8xi32>
    %c2_i32 = arith.constant 2 : i32
    %12 = vector.broadcast %c2_i32 : i32 to vector<2x8xi32>
    %13 = arith.select %11, %12, %9 : vector<2x8xi1>, vector<2x8xi32>
    %c8_i32 = arith.constant 8 : i32
    %14 = vector.broadcast %c8_i32 : i32 to vector<2x8xi32>
    %15 = arith.cmpi eq, %0, %14 : vector<2x8xi32>
    %c3_i32 = arith.constant 3 : i32
    %16 = vector.broadcast %c3_i32 : i32 to vector<2x8xi32>
    %17 = arith.select %15, %16, %13 : vector<2x8xi1>, vector<2x8xi32>
    %c0_2 = arith.constant 0 : index
    %c0_3 = arith.constant 0 : index
    %18 = vector.load %arg2[%c0_2, %c0_3] : memref<2x8xi32, #tpu.memory_space<vmem>>, vector<2x8xi32>
    tpu.vector_store %arg2[%c0_2, %c0_3], %17 {strides = array<i32>} : memref<2x8xi32, #tpu.memory_space<vmem>>, vector<2x8xi32>,
    return
  }
  func.func @transform_0(%arg0: i32) -> (i32, i32) {
    %c0_i32 = arith.constant 0 : i32
    %c0_i32_0 = arith.constant 0 : i32
    return %arg0, %c0_i32 : i32, i32
  }
  func.func @transform_1(%arg0: i32) -> (i32, i32) {
    %c0_i32 = arith.constant 0 : i32
    %c0_i32_0 = arith.constant 0 : i32
    return %arg0, %c0_i32 : i32, i32
  }
}

</mosaic_0001>

<bundles_post_ra>
// kernel: tpu_custom_call.1
= control target key start
LH: loop header
LB: loop body
LE: loop exit
PB: predicated region body
PF: predicated region fallthrough
CT: control target
= control target key end

     0   :  { %6 = vsyncpa [#allocation3], 0  ;;  %s135_s0 = inlined_call_operand.hbm [shape: s32[2,8], index: 0, kind: input, shape index: {}]   ;;  %s136_s1 = inlined_call_operand.hbm [shape: s32[2,8], index: 1, kind: output, shape index: {}]  }
   0x1   :  { %7 = vsyncpa [#allocation4], 0  ;;  %s98_s6 = smov [#allocation2]   ;;  %s50_s10 = scalar_lea.hbm %s135_s0, 32 }
   0x2   :  { %s14_s7 = sshll.u32 %s98_s6, 4  ;;  %p51_p0 = scmp.ne.s32.totalorder %s135_s0, %s50_s10  ;;  %s15_s7 = int_to_ptr.vmem [resolvable:$true] %s14_s7 }
   0x3   :  { %p54_p1 = scmp.lt.u32.totalorder %s50_s10, %s135_s0 }
   0x5   :  { %p56_p2 = pnand %p54_p1, %p51_p0 }
   0x7   :  { %59 = shalt.err (!%p56_p2)
}
   0x8   :  { %s60_s15 = scalar_lea.vmem %s15_s7, 32  ;;  %p65_p4 = scmp.lt.s32.totalorder %s15_s7, %s15_s7 }
   0x9   :  { %p61_p3 = scmp.ne.s32.totalorder %s15_s7, %s60_s15  ;;  %p66_p5 = scmp.lt.s32.totalorder %s60_s15, %s60_s15 }
   0xb   :  { %p67_p6 = por %p66_p5, %p65_p4 }
   0xd   :  { %p68_p7 = pnand %p67_p6, %p61_p3 }
   0xf   :  { %71 = shalt.err (!%p68_p7)
}
  0x10   :  { %17 = dma.hbm_to_vmem [thread:$0]  %s135_s0, 32, %s15_s7, [#allocation3]  }
  0x11   :  { %94 = dma.done.wait [#allocation3], 32  }
  0x12   :  { %95 = vsyncadd [#allocation3], 4294967264  ;;  %v21_v0 = vld [vmem:[#allocation2] sm:$0x3]  ;;  %s99_s18 = smov [#allocation5]   ;;  %v100_v1 = vmov 4294967295  }
  0x13   :  { %vm22_vm0 = vcmp.eq.s32.totalorder %v21_v0, 1  ;;  %vm24_vm1 = vcmp.eq.s32.totalorder %v21_v0, 6  ;;  %vm26_vm2 = vcmp.eq.s32.totalorder %v21_v0, 7  ;;  %s38_s19 = sshll.u32 %s99_s18, 4  ;;  %vm28_vm3 = vcmp.eq.s32.totalorder %v21_v0, 8  ;;  %s39_s19 = int_to_ptr.vmem [resolvable:$true] %s38_s19 }
  0x14   :  { %v23_v2 = vsel %vm22_vm0, 0, %v100_v1  ;;  %vm30_vm4 = vcmask 58368   ;;  %s72_s20 = scalar_lea.vmem %s39_s19, 32  ;;  %p77_p9 = scmp.lt.s32.totalorder %s39_s19, %s39_s19 }
  0x15   :  { %v25_v3 = vsel %vm24_vm1, 1, %v23_v2  ;;  %p73_p8 = scmp.ne.s32.totalorder %s39_s19, %s72_s20  ;;  %p78_p10 = scmp.lt.s32.totalorder %s72_s20, %s72_s20 }
  0x16   :  { %v27_v4 = vsel %vm26_vm2, 2, %v25_v3 }
  0x17   :  { %v29_v5 = vsel %vm28_vm3, 3, %v27_v4  ;;  %p79_p11 = por %p78_p10, %p77_p9 }
  0x18   :  { %31 = vst.msk [vmem:[#allocation5] sm:$0x3] %vm30_vm4, %v29_v5 }
  0x19   :  { %p80_p12 = pnand %p79_p11, %p73_p8 }
  0x1b   :  { %83 = shalt.err (!%p80_p12)
}
  0x1c   :  { %s84_s22 = scalar_lea.hbm %s136_s1, 32 }
  0x1d   :  { %p85_p13 = scmp.ne.s32.totalorder %s136_s1, %s84_s22  ;;  %p88_p0 = scmp.lt.u32.totalorder %s84_s22, %s136_s1 }
  0x1f   :  { %p90_p1 = pnand %p88_p0, %p85_p13 }
  0x21   :  { %93 = shalt.err (!%p90_p1)
}
  0x22   :  { %41 = dma.vmem_to_hbm [thread:$0]  %s39_s19, 32, %s136_s1, [#allocation4]  }
  0x23   :  { %96 = dma.done.wait [#allocation4], 32  }
  0x24   :  { %97 = vsyncadd [#allocation4], 4294967264 }
  0x25   :  { %45 = vsyncpa [#allocation3], 1 }
  0x26   :  { %46 = vsyncpa [#allocation4], 1 }

</bundles_post_ra>
